<compile_context>
chip_gen: v7x
topology: tpu7x:2x2x1
jax: 0.10.0
libtpu: 0.0.40
codegen_flags: <defaults>
</compile_context>

<pallas_src>
import jax
import jax.numpy as jnp
from jax.experimental import pallas as pl
from jax.experimental.pallas import tpu as pltpu


def _round_up(x: int, m: int) -> int:
    return ((x + m - 1) // m) * m


def _vmem_budget_bytes() -> int:
    """Generation-aware usable-VMEM budget (leave headroom for Mosaic scratch)."""
    try:
        info = pltpu.get_tpu_info()
        cap = getattr(info, "vmem_capacity_bytes", None)
        if cap:
            return int(cap * 0.75)
    except Exception:
        pass
    return 48 * 1024 * 1024  # safe on every generation (v7x has 64 MiB/TC physical)


def _cost(flops, bytes_accessed, transcendentals=0):
    try:
        return pl.CostEstimate(
            flops=int(flops),
            transcendentals=int(transcendentals),
            bytes_accessed=int(bytes_accessed),
        )
    except Exception:
        return None


def _select_tb(batch: int) -> int:
    """Batch tile: multiple of 16 (bf16 sublanes), minimize padded rows, cap at 256."""
    if batch <= 64:
        return min(64, _round_up(batch, 16))
    best, best_pad = 256, _round_up(batch, 256) - batch
    for tb in (128, 64):
        pad = _round_up(batch, tb) - batch
        if pad < best_pad:
            best, best_pad = tb, pad
    return best


# ----------------------------------------------------------------------------
# Kernel 1a (fast path): fully fused forward with W1^T resident in VMEM.
#   Grid = (batch_blocks,) only.  No accumulator, no pl.when.
#     h = relu(x @ W1^T + b1);  y = h @ W2^T + b2
# ----------------------------------------------------------------------------
def _make_mlp_resident_kernel(return_hidden: bool):
    def kernel(x_ref, w1t_ref, b1_ref, w2t_ref, b2_ref, *out_refs):
        if return_hidden:
            h_ref, y_ref = out_refs
        else:
            (y_ref,) = out_refs
        acc = jnp.dot(x_ref[...], w1t_ref[...], preferred_element_type=jnp.float32)
        h = jnp.maximum(acc + b1_ref[...], 0.0)          # f32 bias + ReLU epilogue
        if return_hidden:
            h_ref[...] = h
        y = jnp.dot(h.astype(w2t_ref.dtype), w2t_ref[...],
                    preferred_element_type=jnp.float32) + b2_ref[...]
        y_ref[...] = y.astype(y_ref.dtype)

    return kernel


def mlp_forward_resident(x_p, w1t_p, b1_p, w2t_p, b2_p, *, tb, return_hidden,
                         vmem_limit):
    B_p, D_in_p = x_p.shape
    H_p = w1t_p.shape[1]
    D_out_p = w2t_p.shape[1]
    grid = (B_p // tb,)

    in_specs = [
        pl.BlockSpec((tb, D_in_p), lambda b: (b, 0)),        # x (batch-tiled)
        pl.BlockSpec((D_in_p, H_p), lambda b: (0, 0)),       # W1^T (VMEM-resident)
        pl.BlockSpec((1, H_p), lambda b: (0, 0)),            # b1
        pl.BlockSpec((H_p, D_out_p), lambda b: (0, 0)),      # W2^T (VMEM-resident)
        pl.BlockSpec((1, D_out_p), lambda b: (0, 0)),        # b2
    ]
    y_spec = pl.BlockSpec((tb, D_out_p), lambda b: (b, 0))
    if return_hidden:
        out_shape = (jax.ShapeDtypeStruct((B_p, H_p), jnp.float32),
                     jax.ShapeDtypeStruct((B_p, D_out_p), jnp.float32))
        out_specs = (pl.BlockSpec((tb, H_p), lambda b: (b, 0)), y_spec)
    else:
        out_shape = jax.ShapeDtypeStruct((B_p, D_out_p), jnp.float32)
        out_specs = y_spec

    bytes_in = (x_p.size + w1t_p.size + w2t_p.size) * 2 + (b1_p.size + b2_p.size) * 4
    bytes_out = B_p * D_out_p * 4 + (B_p * H_p * 4 if return_hidden else 0)
    cost = _cost(flops=2 * B_p * (D_in_p * H_p + H_p * D_out_p),
                 bytes_accessed=bytes_in + bytes_out)

    return pl.pallas_call(
        _make_mlp_resident_kernel(return_hidden),
        out_shape=out_shape,
        grid_spec=pltpu.PrefetchScalarGridSpec(
            num_scalar_prefetch=0,
            grid=grid,
            in_specs=in_specs,
            out_specs=out_specs,
        ),
        compiler_params=pltpu.CompilerParams(
            dimension_semantics=("parallel",),
            vmem_limit_bytes=vmem_limit,
        ),
        cost_estimate=cost,
    )(x_p, w1t_p, b1_p, w2t_p, b2_p)


# ----------------------------------------------------------------------------
# Kernel 1b (fallback for very large input_dim): K-tiled reduction over D_in.
#   Grid = (batch_blocks ["parallel"], k_blocks ["arbitrary"]).
#   return_hidden=True accumulates directly into the resident f32 h output block.
# ----------------------------------------------------------------------------
def _make_mlp_ktiled_kernel(return_hidden: bool):
    def kernel(x_ref, w1t_ref, b1_ref, w2t_ref, b2_ref, *rest):
        if return_hidden:
            h_ref, y_ref = rest
            acc_ref = h_ref                 # f32 output block, resident across k
        else:
            y_ref, acc_ref = rest

        k = pl.program_id(1)

        @pl.when(k == 0)
        def _init():
            acc_ref[...] = jnp.zeros_like(acc_ref)

        acc_ref[...] += jnp.dot(x_ref[...], w1t_ref[...],
                                preferred_element_type=jnp.float32)

        @pl.when(k == pl.num_programs(1) - 1)
        def _finalize():
            h = jnp.maximum(acc_ref[...] + b1_ref[...], 0.0)
            if return_hidden:
                h_ref[...] = h
            y = jnp.dot(h.astype(w2t_ref.dtype), w2t_ref[...],
                        preferred_element_type=jnp.float32) + b2_ref[...]
            y_ref[...] = y.astype(y_ref.dtype)

    return kernel


def mlp_forward_ktiled(x_p, w1t_p, b1_p, w2t_p, b2_p, *, tb, tk, return_hidden,
                       vmem_limit):
    B_p, D_in_p = x_p.shape
    H_p = w1t_p.shape[1]
    D_out_p = w2t_p.shape[1]
    grid = (B_p // tb, D_in_p // tk)

    in_specs = [
        pl.BlockSpec((tb, tk), lambda b, k: (b, k)),          # x
        pl.BlockSpec((tk, H_p), lambda b, k: (k, 0)),         # W1^T (K-tiled)
        pl.BlockSpec((1, H_p), lambda b, k: (0, 0)),          # b1
        pl.BlockSpec((H_p, D_out_p), lambda b, k: (0, 0)),    # W2^T
        pl.BlockSpec((1, D_out_p), lambda b, k: (0, 0)),      # b2
    ]
    y_spec = pl.BlockSpec((tb, D_out_p), lambda b, k: (b, 0))
    if return_hidden:
        out_shape = (jax.ShapeDtypeStruct((B_p, H_p), jnp.float32),
                     jax.ShapeDtypeStruct((B_p, D_out_p), jnp.float32))
        out_specs = (pl.BlockSpec((tb, H_p), lambda b, k: (b, 0)), y_spec)
        scratch = []                                          # h output is the accumulator
    else:
        out_shape = jax.ShapeDtypeStruct((B_p, D_out_p), jnp.float32)
        out_specs = y_spec
        scratch = [pltpu.VMEM((tb, H_p), jnp.float32)]

    # W1 is re-streamed once per batch block in this path.
    bytes_in = (x_p.size + w1t_p.size * (B_p // tb) + w2t_p.size) * 2 \
        + (b1_p.size + b2_p.size) * 4
    bytes_out = B_p * D_out_p * 4 + (B_p * H_p * 4 if return_hidden else 0)
    cost = _cost(flops=2 * B_p * (D_in_p * H_p + H_p * D_out_p),
                 bytes_accessed=bytes_in + bytes_out)

    return pl.pallas_call(
        _make_mlp_ktiled_kernel(return_hidden),
        out_shape=out_shape,
        grid_spec=pltpu.PrefetchScalarGridSpec(
            num_scalar_prefetch=0,
            grid=grid,
            in_specs=in_specs,
            out_specs=out_specs,
            scratch_shapes=scratch,
        ),
        compiler_params=pltpu.CompilerParams(
            dimension_semantics=("parallel", "arbitrary"),
            vmem_limit_bytes=vmem_limit,
        ),
        cost_estimate=cost,
    )(x_p, w1t_p, b1_p, w2t_p, b2_p)


# ----------------------------------------------------------------------------
# Kernel 2: input importance = per-column L2 norm of W1 ([H, D_in]).
# Tiled over D_in (lanes, "parallel") AND H (sublanes, reduction axis, last /
# "arbitrary"); the f32 output block is the resident sum-of-squares accumulator,
# so VMEM use is independent of hidden_dim (v7x-safe).
# ----------------------------------------------------------------------------
def _column_norm_kernel(w_ref, imp_ref):
    h = pl.program_id(1)

    @pl.when(h == 0)
    def _init():
        imp_ref[...] = jnp.zeros_like(imp_ref)

    w = w_ref[...]
    imp_ref[...] += jnp.sum(w * w, axis=0, keepdims=True)

    @pl.when(h == pl.num_programs(1) - 1)
    def _finalize():
        imp_ref[...] = jnp.sqrt(imp_ref[...])


def input_importance_pallas(w1, vmem_limit):
    H, D_in = w1.shape
    th = min(512, _round_up(H, 8))
    tn = min(512, _round_up(D_in, 128))
    H_p = _round_up(H, th)
    D_in_p = _round_up(D_in, tn)

    w1f = w1.astype(jnp.float32)
    if H_p != H or D_in_p != D_in:
        w1_p = jnp.zeros((H_p, D_in_p), jnp.float32).at[:H, :D_in].set(w1f)
    else:
        w1_p = w1f

    cost = _cost(flops=2 * H_p * D_in_p,
                 bytes_accessed=H_p * D_in_p * 4 + D_in_p * 4,
                 transcendentals=D_in_p)

    imp = pl.pallas_call(
        _column_norm_kernel,
        out_shape=jax.ShapeDtypeStruct((1, D_in_p), jnp.float32),
        grid_spec=pltpu.PrefetchScalarGridSpec(
            num_scalar_prefetch=0,
            grid=(D_in_p // tn, H_p // th),
            in_specs=[pl.BlockSpec((th, tn), lambda j, h: (h, j))],
            out_specs=pl.BlockSpec((1, tn), lambda j, h: (0, j)),
        ),
        compiler_params=pltpu.CompilerParams(
            dimension_semantics=("parallel", "arbitrary"),
            vmem_limit_bytes=vmem_limit,
        ),
        cost_estimate=cost,
    )(w1_p)
    return imp[0, :D_in]


# ----------------------------------------------------------------------------
# DeepType-style model (JAX/Pallas port of the PyTorch DeeptypeModel interface)
# ----------------------------------------------------------------------------
class DeeptypeMLPPallas:
    def __init__(self, input_dim, hidden_dim, output_dim, key,
                 compute_dtype=jnp.bfloat16):
        self.input_dim = input_dim
        self.hidden_dim = hidden_dim
        self.output_dim = output_dim
        self.compute_dtype = compute_dtype

        k1, k2, k3, k4 = jax.random.split(key, 4)
        # Master copies in PyTorch nn.Linear convention ([out_features, in_features]).
        self.w1 = jax.random.normal(k1, (hidden_dim, input_dim), jnp.float32) * 0.1
        self.b1 = jax.random.normal(k2, (hidden_dim,), jnp.float32) * 0.01
        self.w2 = jax.random.normal(k3, (output_dim, hidden_dim), jnp.float32) * 0.1
        self.b2 = jax.random.normal(k4, (output_dim,), jnp.float32) * 0.01

        self._vmem_budget = _vmem_budget_bytes()
        self._h_p = _round_up(hidden_dim, 128)
        self._d_out_p = _round_up(output_dim, 128)

        # Decide once whether W1^T can stay VMEM-resident (double-buffer-conservative
        # estimate incl. the largest per-batch-block buffers at tb=256).
        wb = 2  # bf16
        weights_vmem = 2 * wb * (input_dim * self._h_p + self._h_p * self._d_out_p)
        block_vmem = 2 * (256 * input_dim * wb + 256 * self._h_p * 4
                          + 256 * self._d_out_p * 4) + 2 * 4 * (self._h_p + self._d_out_p)
        self._resident = (weights_vmem + block_vmem) < 0.6 * self._vmem_budget

        if self._resident:
            self._d_in_p = input_dim        # full-dim blocks: no D_in pad, no x pad-copy
            self._tk = None
        else:
            tk = 1024 if (1024 * self._h_p * wb * 2) <= self._vmem_budget // 4 else 512
            self._tk = tk
            self._d_in_p = _round_up(input_dim, tk)

        # One-time: transpose, zero-pad lane dims, cast matmul operands to bf16;
        # biases stay f32 for the f32 epilogue.
        self._w1t_p = jnp.zeros((self._d_in_p, self._h_p), compute_dtype).at[
            :input_dim, :hidden_dim].set(self.w1.T.astype(compute_dtype))
        self._w2t_p = jnp.zeros((self._h_p, self._d_out_p), compute_dtype).at[
            :hidden_dim, :output_dim].set(self.w2.T.astype(compute_dtype))
        self._b1_p = jnp.zeros((1, self._h_p), jnp.float32).at[
            0, :hidden_dim].set(self.b1)
        self._b2_p = jnp.zeros((1, self._d_out_p), jnp.float32).at[
            0, :output_dim].set(self.b2)

    # ---- internal: (maybe) pad batch, run fused kernel, slice padding off ----
    def _run(self, x, return_hidden):
        B, D_in = x.shape
        assert D_in == self.input_dim
        tb = _select_tb(B)
        B_p = _round_up(B, tb)

        xc = x.astype(self.compute_dtype)
        if B_p != B or self._d_in_p != D_in:
            x_p = jnp.zeros((B_p, self._d_in_p), self.compute_dtype).at[
                :B, :D_in].set(xc)
        else:
            x_p = xc                         # no wrapper-side pad copy

        if self._resident:
            out = mlp_forward_resident(
                x_p, self._w1t_p, self._b1_p, self._w2t_p, self._b2_p,
                tb=tb, return_hidden=return_hidden, vmem_limit=self._vmem_budget)
        else:
            out = mlp_forward_ktiled(
                x_p, self._w1t_p, self._b1_p, self._w2t_p, self._b2_p,
                tb=tb, tk=self._tk, return_hidden=return_hidden,
                vmem_limit=self._vmem_budget)

        if return_hidden:
            h_p, y_p = out
            return h_p[:B, :self.hidden_dim], y_p[:B, :self.output_dim]
        return out[:B, :self.output_dim]

    def forward(self, x):
        # Forward-only variant: hidden activation never written back to HBM.
        return self._run(x, return_hidden=False)

    def get_input_layer_weights(self):
        return self.w1

    def get_hidden_representations(self, x):
        h, _ = self._run(x, return_hidden=True)
        return h

    def get_input_importance(self):
        return input_importance_pallas(self.get_input_layer_weights(),
                                       self._vmem_budget)

    def get_sorted_input_indices(self):
        importance = self.get_input_importance()
        # TODO(synk): argsort stays in plain JAX (no Pallas sort primitive needed).
        return jnp.argsort(-importance)


if __name__ == "__main__":
    key = jax.random.PRNGKey(0)
    k_model, k_x = jax.random.split(key)

    batch, input_dim, hidden_dim, output_dim = 8, 16, 32, 8
    model = DeeptypeMLPPallas(input_dim, hidden_dim, output_dim, k_model)
    x = jax.random.normal(k_x, (batch, input_dim), jnp.float32)

    # Run Pallas kernels.
    y = model.forward(x)
    h = model.get_hidden_representations(x)
    imp = model.get_input_importance()
    idx = model.get_sorted_input_indices()
    jax.block_until_ready((y, h, imp, idx))

    # Pure-JAX f32 reference.
    h_ref = jnp.maximum(x @ model.w1.T + model.b1, 0.0)
    y_ref = h_ref @ model.w2.T + model.b2
    imp_ref = jnp.sqrt(jnp.sum(model.w1 * model.w1, axis=0))
    idx_ref = jnp.argsort(-imp_ref)

    assert y.shape == (batch, output_dim)
    assert h.shape == (batch, hidden_dim)
    assert imp.shape == (input_dim,)
    # Matmul operands are bf16 (f32 accumulation/epilogue) -> loosened tolerance.
    assert jnp.allclose(y, y_ref, atol=5e-2, rtol=5e-2), float(jnp.max(jnp.abs(y - y_ref)))
    assert jnp.allclose(h, h_ref, atol=5e-2, rtol=5e-2), float(jnp.max(jnp.abs(h - h_ref)))
    assert jnp.allclose(imp, imp_ref, atol=1e-5, rtol=1e-5)
    assert jnp.array_equal(idx, idx_ref)

    print("KERNEL_OK")
</pallas_src>

<mosaic_0001>
module attributes {stable_mosaic.version = 11 : i64} {
  func.func @kernel(%arg0: i32, %arg1: memref<16x16xbf16, #tpu.memory_space<vmem>>, %arg2: memref<16x128xbf16, #tpu.memory_space<vmem>>, %arg3: memref<1x128xf32, #tpu.memory_space<vmem>>, %arg4: memref<128x128xbf16, #tpu.memory_space<vmem>>, %arg5: memref<1x128xf32, #tpu.memory_space<vmem>>, %arg6: memref<16x128xf32, #tpu.memory_space<vmem>>) attributes {dimension_semantics = [#tpu.dimension_semantics<parallel>], iteration_bounds = array<i64: 1>, scalar_prefetch = 0 : i64, scratch_operands = 0 : i64, tpu.core_type = #tpu.core_type<tc>, window_params = [{transform_indices = @transform_0, window_bounds = array<i64: 16, 16>}, {pipeline_mode = #tpu.pipeline_mode<synchronous>, transform_indices = @transform_1, window_bounds = array<i64: 16, 128>}, {pipeline_mode = #tpu.pipeline_mode<synchronous>, transform_indices = @transform_2, window_bounds = array<i64: 1, 128>}, {pipeline_mode = #tpu.pipeline_mode<synchronous>, transform_indices = @transform_3, window_bounds = array<i64: 128, 128>}, {pipeline_mode = #tpu.pipeline_mode<synchronous>, transform_indices = @transform_4, window_bounds = array<i64: 1, 128>}, {transform_indices = @transform_5, window_bounds = array<i64: 16, 128>}]} {
    %c0 = arith.constant 0 : index
    %c0_0 = arith.constant 0 : index
    %0 = vector.load %arg1[%c0, %c0_0] : memref<16x16xbf16, #tpu.memory_space<vmem>>, vector<16x16xbf16>
    %c0_1 = arith.constant 0 : index
    %c0_2 = arith.constant 0 : index
    %1 = vector.load %arg2[%c0_1, %c0_2] : memref<16x128xbf16, #tpu.memory_space<vmem>>, vector<16x128xbf16>
    %cst = arith.constant dense<0.000000e+00> : vector<16x128xf32>
    %2 = tpu.matmul %0, %1, %cst {dimension_numbers = #tpu.dot_dimension_numbers<[1], [0], [0], [1], [0, 0, 1, 1], [], []>} : vector<16x16xbf16>, vector<16x128xbf16>, vector<16x128xf32> -> vector<16x128xf32>
    %c0_3 = arith.constant 0 : index
    %c0_4 = arith.constant 0 : index
    %3 = vector.load %arg3[%c0_3, %c0_4] : memref<1x128xf32, #tpu.memory_space<vmem>>, vector<1x128xf32>
    %4 = vector.broadcast %3 : vector<1x128xf32> to vector<16x128xf32>
    %5 = arith.addf %2, %4 : vector<16x128xf32>
    %cst_5 = arith.constant 0.000000e+00 : f32
    %6 = vector.broadcast %cst_5 : f32 to vector<16x128xf32>
    %7 = arith.maximumf %5, %6 : vector<16x128xf32>
    %8 = arith.truncf %7 : vector<16x128xf32> to vector<16x128xbf16>
    %c0_6 = arith.constant 0 : index
    %c0_7 = arith.constant 0 : index
    %9 = vector.load %arg4[%c0_6, %c0_7] : memref<128x128xbf16, #tpu.memory_space<vmem>>, vector<128x128xbf16>
    %cst_8 = arith.constant dense<0.000000e+00> : vector<16x128xf32>
    %10 = tpu.matmul %8, %9, %cst_8 {dimension_numbers = #tpu.dot_dimension_numbers<[1], [0], [0], [1], [0, 0, 1, 1], [], []>} : vector<16x128xbf16>, vector<128x128xbf16>, vector<16x128xf32> -> vector<16x128xf32>
    %c0_9 = arith.constant 0 : index
    %c0_10 = arith.constant 0 : index
    %11 = vector.load %arg5[%c0_9, %c0_10] : memref<1x128xf32, #tpu.memory_space<vmem>>, vector<1x128xf32>
    %12 = vector.broadcast %11 : vector<1x128xf32> to vector<16x128xf32>
    %13 = arith.addf %10, %12 : vector<16x128xf32>
    %c0_11 = arith.constant 0 : index
    %c0_12 = arith.constant 0 : index
    %14 = vector.load %arg6[%c0_11, %c0_12] : memref<16x128xf32, #tpu.memory_space<vmem>>, vector<16x128xf32>
    tpu.vector_store %arg6[%c0_11, %c0_12], %13 {strides = array<i32>} : memref<16x128xf32, #tpu.memory_space<vmem>>, vector<16x128xf32>,
    return
  }
  func.func @transform_0(%arg0: i32) -> (i32, i32) {
    %c0_i32 = arith.constant 0 : i32
    %c0_i32_0 = arith.constant 0 : i32
    return %arg0, %c0_i32 : i32, i32
  }
  func.func @transform_1(%arg0: i32) -> (i32, i32) {
    %c0_i32 = arith.constant 0 : i32
    %c0_i32_0 = arith.constant 0 : i32
    %c0_i32_1 = arith.constant 0 : i32
    return %c0_i32, %c0_i32_0 : i32, i32
  }
  func.func @transform_2(%arg0: i32) -> (i32, i32) {
    %c0_i32 = arith.constant 0 : i32
    %c0_i32_0 = arith.constant 0 : i32
    %c0_i32_1 = arith.constant 0 : i32
    return %c0_i32, %c0_i32_0 : i32, i32
  }
  func.func @transform_3(%arg0: i32) -> (i32, i32) {
    %c0_i32 = arith.constant 0 : i32
    %c0_i32_0 = arith.constant 0 : i32
    %c0_i32_1 = arith.constant 0 : i32
    return %c0_i32, %c0_i32_0 : i32, i32
  }
  func.func @transform_4(%arg0: i32) -> (i32, i32) {
    %c0_i32 = arith.constant 0 : i32
    %c0_i32_0 = arith.constant 0 : i32
    %c0_i32_1 = arith.constant 0 : i32
    return %c0_i32, %c0_i32_0 : i32, i32
  }
  func.func @transform_5(%arg0: i32) -> (i32, i32) {
    %c0_i32 = arith.constant 0 : i32
    %c0_i32_0 = arith.constant 0 : i32
    return %arg0, %c0_i32 : i32, i32
  }
}

</mosaic_0001>

<bundles_post_ra>
// kernel: tpu_custom_call.1
= control target key start
LH: loop header
LB: loop body
LE: loop exit
PB: predicated region body
PF: predicated region fallthrough
CT: control target
= control target key end

     0   :  { %10 = vsyncpa [#allocation3], 0  ;;  %s539_s0 = inlined_call_operand.hbm [shape: bf16[16,16], index: 0, kind: input, shape index: {}]   ;;  %s540_s1 = inlined_call_operand.hbm [shape: bf16[16,128], index: 1, kind: input, shape index: {}]   ;;  %s541_s2 = inlined_call_operand.vmem [shape: f32[1,128], index: 2, kind: input, shape index: {}]   ;;  %s542_s3 = inlined_call_operand.hbm [shape: bf16[128,128], index: 3, kind: input, shape index: {}]   ;;  %s543_s4 = inlined_call_operand.vmem [shape: f32[1,128], index: 4, kind: input, shape index: {}]   ;;  %s544_s5 = inlined_call_operand.hbm [shape: f32[16,128], index: 5, kind: output, shape index: {}]  }
   0x1   :  { %11 = vsyncpa [#allocation6], 0 }
   0x2   :  { %12 = vsyncpa [#allocation4], 0  ;;  %s429_s18 = smov [#allocation5]   ;;  %s430_s20 = smov [#allocation2]  }
   0x3   :  { %s30_s19 = sshll.u32 %s429_s18, 4  ;;  %s18_s21 = sshll.u32 %s430_s20, 4  ;;  %s31_s19 = int_to_ptr.vmem [resolvable:$true] %s30_s19  ;;  %s469_s21 = int_to_ptr.vmem [resolvable:$true] %s18_s21 }
   0x4   :  { %s335_s24 = scalar_lea.hbm %s540_s1, 128 }
   0x5   :  { %p336_p0 = scmp.ne.s32.totalorder %s540_s1, %s335_s24  ;;  %p339_p1 = scmp.lt.u32.totalorder %s335_s24, %s540_s1 }
   0x7   :  { %p341_p2 = pnand %p339_p1, %p336_p0 }
   0x9   :  { %344 = shalt.err (!%p341_p2)
}
   0xa   :  { %s345_s29 = scalar_lea.vmem %s31_s19, 128  ;;  %p350_p4 = scmp.lt.s32.totalorder %s31_s19, %s31_s19 }
   0xb   :  { %p346_p3 = scmp.ne.s32.totalorder %s31_s19, %s345_s29  ;;  %p351_p5 = scmp.lt.s32.totalorder %s345_s29, %s345_s29 }
   0xd   :  { %p352_p6 = por %p351_p5, %p350_p4 }
   0xf   :  { %p353_p7 = pnand %p352_p6, %p346_p3 }
  0x11   :  { %356 = shalt.err (!%p353_p7)
}
  0x12   :  { %s431_s30 = smov 64   ;;  %s432_s6 = smov 4  }
  0x13   :  { %36 = dma.hbm_to_vmem [thread:$0]  %s540_s1, 128, %s31_s19, [#allocation6], %s431_s30, %s431_s30, %s432_s6  }
  0x14   :  { %s357_s11 = scalar_lea.hbm %s539_s0, 128 }
  0x15   :  { %p358_p8 = scmp.ne.s32.totalorder %s539_s0, %s357_s11  ;;  %p361_p9 = scmp.lt.u32.totalorder %s357_s11, %s539_s0 }
  0x17   :  { %p363_p10 = pnand %p361_p9, %p358_p8 }
  0x19   :  { %366 = shalt.err (!%p363_p10)
}
  0x1a   :  { %s367_s16 = scalar_lea.vmem %s469_s21, 128  ;;  %p372_p12 = scmp.lt.s32.totalorder %s469_s21, %s469_s21 }
  0x1b   :  { %p368_p11 = scmp.ne.s32.totalorder %s469_s21, %s367_s16  ;;  %p373_p13 = scmp.lt.s32.totalorder %s367_s16, %s367_s16 }
  0x1d   :  { %p374_p0 = por %p373_p13, %p372_p12 }
  0x1f   :  { %p375_p1 = pnand %p374_p0, %p368_p11 }
  0x21   :  { %378 = shalt.err (!%p375_p1)
}
  0x22   :  { %24 = dma.hbm_to_vmem [thread:$0]  %s539_s0, 128, %s469_s21, [#allocation3], %s431_s30, %s431_s30, %s432_s6  }
  0x23   :  { %s433_s18 = smov [#allocation7]   ;;  %s379_s23 = scalar_lea.hbm %s542_s3, 1024 }
  0x24   :  { %s44_s19 = sshll.u32 %s433_s18, 4  ;;  %p380_p2 = scmp.ne.s32.totalorder %s542_s3, %s379_s23  ;;  %s45_s19 = int_to_ptr.vmem [resolvable:$true] %s44_s19 }
  0x25   :  { %p383_p3 = scmp.lt.u32.totalorder %s379_s23, %s542_s3 }
  0x27   :  { %p385_p4 = pnand %p383_p3, %p380_p2 }
  0x29   :  { %388 = shalt.err (!%p385_p4)
}
  0x2a   :  { %s389_s28 = scalar_lea.vmem %s45_s19, 1024  ;;  %p394_p6 = scmp.lt.s32.totalorder %s45_s19, %s45_s19 }
  0x2b   :  { %p390_p5 = scmp.ne.s32.totalorder %s45_s19, %s389_s28  ;;  %p395_p7 = scmp.lt.s32.totalorder %s389_s28, %s389_s28 }
  0x2d   :  { %p396_p8 = por %p395_p7, %p394_p6 }
  0x2f   :  { %p397_p9 = pnand %p396_p8, %p390_p5 }
  0x31   :  { %400 = shalt.err (!%p397_p9)
}
  0x32   :  { %50 = dma.hbm_to_vmem [thread:$0]  %s542_s3, 1024, %s45_s19, [#allocation6], %s431_s30, %s431_s30, %s432_s6  }
  0x33   :  { %423 = dma.done.wait [#allocation3], 128  }
  0x34   :  { %424 = vsyncadd [#allocation3], 4294967168 }
  0x35   :  { %425 = dma.done.wait [#allocation6], 1152  }
  0x36   :  { %426 = vsyncadd [#allocation6], 4294966144  ;;  %v434_v0 = vmov 0.0   ;;  %vm435_vm0 = vmmov 0   ;;  %v325_v1 = vld [vmem:[#allocation5] sm:$0xff]   ;;  %v326_v2 = vld [vmem:[#allocation2] sm:$0xff]  }
  0x37   :  { %289 = vmatprep.subr.bf16.mxu0 %v434_v0  ;;  %291 = vmatprep.mubr.msk.bf16.mxu0 %vm435_vm0, %v434_v0  ;;  %vm85_vm1 = vcmask 130048   ;;  %v327_v3 = vld [vmem:[#allocation7] sm:$0xff]   ;;  %v328_v4 = vld [vmem:[#allocation7 + $0x8] sm:$0xff]   ;;  %v329_v5 = vld [vmem:[#allocation7 + $0x10] sm:$0xff]   ;;  %s436_s7 = smov [#allocation8]  }
  0x38   :  { %295 = vmatprep.subr.bf16.mxu1 %v434_v0  ;;  %311 = vmatprep.mubr.msk.bf16.mxu1 %vm435_vm0, %v434_v0  ;;  %v330_v6 = vld [vmem:[#allocation7 + $0x18] sm:$0xff]   ;;  %v331_v7 = vld [vmem:[#allocation7 + $0x20] sm:$0xff]   ;;  %v332_v8 = vld [vmem:[#allocation7 + $0x28] sm:$0xff]   ;;  %s252_s8 = sshll.u32 %s436_s7, 4  ;;  %s253_s8 = int_to_ptr.vmem [resolvable:$true] %s252_s8 }
  0x39   :  { %290 = vmatpush3.bf16.msra.mxu0 %v325_v1  ;;  %296 = vmatpush3.bf16.msra.mxu1 %v327_v3  ;;  %v333_v9 = vld [vmem:[#allocation7 + $0x30] sm:$0xff]   ;;  %v334_v10 = vld [vmem:[#allocation7 + $0x38] sm:$0xff]   ;;  %p406_p11 = scmp.lt.s32.totalorder %s253_s8, %s253_s8 }
  0x3a   :  { %297 = vmatprep.subr.bf16.mxu1 %v434_v0  ;;  %v265_v11 = vld [vmem:[%s541_s2] ss:$0 sm:$0xff]  ;;  %s401_s2 = scalar_lea.vmem %s253_s8, 256 }
  0x3b   :  { %v269_v21 = vld [vmem:[%s543_s4] ss:$0 sm:$0xff]  ;;  %p402_p10 = scmp.ne.s32.totalorder %s253_s8, %s401_s2  ;;  %p407_p12 = scmp.lt.s32.totalorder %s401_s2, %s401_s2 }
  0x3c   :  { %292 = vmatmul.mubr.msk.bf16.vlgmr.msra.gmra.mrb[0].mxu0 %vm85_vm1, %v326_v2 }
  0x3d   :  { %298 = vmatpush3.bf16.msra.mxu1 %v328_v4  ;;  %p408_p13 = por %p407_p12, %p406_p11 }
  0x3e   :  { %299 = vmatprep.subr.bf16.mxu1 %v434_v0 }
  0x3f   :  { %p409_p0 = pnand %p408_p13, %p402_p10 }
  0x41   :  { %300 = vmatpush3.bf16.msra.mxu1 %v329_v5 }
  0x42   :  { %301 = vmatprep.subr.bf16.mxu1 %v434_v0 }
  0x45   :  { %302 = vmatpush3.bf16.msra.mxu1 %v330_v6 }
  0x46   :  { %303 = vmatprep.subr.bf16.mxu1 %v434_v0 }
  0x49   :  { %304 = vmatpush3.bf16.msra.mxu1 %v331_v7 }
  0x4a   :  { %305 = vmatprep.subr.bf16.mxu1 %v434_v0 }
  0x4d   :  { %306 = vmatpush3.bf16.msra.mxu1 %v332_v8 }
  0x4e   :  { %307 = vmatprep.subr.bf16.mxu1 %v434_v0 }
  0x51   :  { %308 = vmatpush3.bf16.msra.mxu1 %v333_v9 }
  0x52   :  { %309 = vmatprep.subr.bf16.mxu1 %v434_v0 }
  0x55   :  { %310 = vmatpush3.bf16.msra.mxu1 %v334_v10 }
 0x10f   :  { %v123_v12 = vpop.f32.mrb[0].mxu0 }
 0x110   :  { %v124_v13 = vadd.f32 %v265_v11, %v123_v12  ;;  %v293_v14 = vpop.f32.mrb[1].mxu0 }
 0x111   :  { %v126_v15 = vpop.f32.mrb[2].mxu0 }
 0x112   :  { %v127_v16 = vadd.f32 %v265_v11, %v126_v15  ;;  %v294_v17 = vpop.f32.mrb[3].mxu0  ;;  %v130_v18 = vmax.f32 %v124_v13, 0.0 }
 0x114   :  { %v131_v19 = vmax.f32 %v127_v16, 0.0 }
 0x116   :  { %v132_v20 = vpack.c.bf16 %v131_v19, %v130_v18 }
 0x118   :  { %312 = vmatmul.mubr.bf16.vlgmr.msra.gmra.mrb[0].mxu1 %v132_v20 }
 0x1eb   :  { %v238_v22 = vpop.f32.mrb[0].mxu1 }
 0x1ec   :  { %v239_v23 = vadd.f32 %v269_v21, %v238_v22  ;;  %v313_v24 = vpop.f32.mrb[1].mxu1 }
 0x1ed   :  { %v241_v25 = vpop.f32.mrb[2].mxu1 }
 0x1ee   :  { %245 = vst [vmem:[#allocation8] sm:$0xff] %v239_v23  ;;  %v242_v26 = vadd.f32 %v269_v21, %v241_v25  ;;  %v314_v27 = vpop.f32.mrb[3].mxu1 }
 0x1f0   :  { %246 = vst [vmem:[#allocation8 + $0x8] sm:$0xff] %v242_v26 }
 0x1f1   :  { %412 = shalt.err (!%p409_p0)
}
 0x1f2   :  { %s413_s10 = scalar_lea.hbm %s544_s5, 256 }
 0x1f3   :  { %p414_p1 = scmp.ne.s32.totalorder %s544_s5, %s413_s10  ;;  %p417_p2 = scmp.lt.u32.totalorder %s413_s10, %s544_s5 }
 0x1f5   :  { %p419_p3 = pnand %p417_p2, %p414_p1 }
 0x1f7   :  { %422 = shalt.err (!%p419_p3)
}
 0x1f8   :  { %s437_s15 = smov 128   ;;  %s438_s16 = smov 8  }
 0x1f9   :  { %258 = dma.vmem_to_hbm [thread:$0]  %s253_s8, 256, %s544_s5, [#allocation4], %s437_s15, %s437_s15, %s438_s16  }
 0x1fa   :  { %427 = dma.done.wait [#allocation4], 256  }
 0x1fb   :  { %428 = vsyncadd [#allocation4], 4294967040 }
 0x1fc   :  { %262 = vsyncpa [#allocation3], 1 }
 0x1fd   :  { %263 = vsyncpa [#allocation6], 1 }
 0x1fe   :  { %264 = vsyncpa [#allocation4], 1 }

</bundles_post_ra>
